<compile_context>
chip_gen: v5e
topology: v5e:2x2
jax: 0.10.0
libtpu: 0.0.40
codegen_flags: <defaults>
</compile_context>

<pallas_src>
import jax
import jax.numpy as jnp
from jax.experimental import pallas as pl
from jax.experimental.pallas import tpu as pltpu

VOCAB = 200
SEQ = 50      # token positions  (= Conv1d(50, ...) in_channels)
EMB = 50      # embedding dim    (= the Conv1d spatial/"length" axis)
C1 = 256      # conv1 out channels
C2 = 50       # conv2 out channels
H1 = 256      # linear1 out features
NCLS = 10     # classes
BN_EPS = 1e-5


def _make_kernel(BB):
    TOK = BB * SEQ  # tokens handled per grid step

    def kernel(ids_ref, tab_ref, w1_ref, b1_ref, w2_ref, b2_ref,
               bns_ref, bnb_ref, w3_ref, b3_ref, w4_ref, b4_ref, out_ref):
        bf16 = jnp.bfloat16
        f32 = jnp.float32

        # ---- Embedding gather as a single MXU matmul (one-hot over vocab). --
        ids = ids_ref[0]                                            # (1, TOK) int32
        vocab_iota = jax.lax.broadcasted_iota(jnp.int32, (VOCAB, TOK), 0)
        onehot = (vocab_iota == ids).astype(bf16)                   # (VOCAB, TOK)
        # rows = embedding dim (conv length axis), cols = (sample, token-channel)
        x_all = jnp.dot(tab_ref[...], onehot,
                        preferred_element_type=f32).astype(bf16)    # (EMB, TOK)

        # ---- Conv1d(50 -> 256, k=3, pad=1): shifts along the length axis. ---
        zrow = jnp.zeros((1, TOK), bf16)
        x_m = jnp.concatenate([zrow, x_all[:EMB - 1, :]], axis=0)   # in[t-1]
        x_p = jnp.concatenate([x_all[1:, :], zrow], axis=0)         # in[t+1]

        def to_rows(x):  # (EMB, BB*SEQ) -> (BB*EMB, SEQ): sample-major rows
            return jnp.concatenate(
                [x[:, b * SEQ:(b + 1) * SEQ] for b in range(BB)], axis=0)

        # fused taps: one (BB*EMB, 3*SEQ) x (3*SEQ, C1) matmul
        xk = jnp.concatenate([to_rows(x_m), to_rows(x_all), to_rows(x_p)],
                             axis=1)                                # (BB*EMB, 3*SEQ)
        h = jnp.dot(xk, w1_ref[...], preferred_element_type=f32)    # (BB*EMB, C1)

        # ---- ReLU + global max-pool over length (bias/relu after pool). -----
        pooled = jnp.concatenate(
            [jnp.max(h[b * EMB:(b + 1) * EMB, :], axis=0, keepdims=True)
             for b in range(BB)], axis=0)                           # (BB, C1)
        m = jnp.maximum(pooled + b1_ref[...], 0.0)

        # ---- Conv1d(256 -> 50, k=3, pad=1) on a length-1 signal: centre tap.
        y = jnp.dot(m.astype(bf16), w2_ref[...],
                    preferred_element_type=f32) + b2_ref[...]       # (BB, C2)

        # Flatten no-op; Dropout(0.3) identity; BatchNorm1d(50) eval (folded).
        y = y * bns_ref[...] + bnb_ref[...]

        # ---- Linear(50 -> 256) + ReLU; Dropout(0.2) identity. ---------------
        z = jnp.dot(y.astype(bf16), w3_ref[...],
                    preferred_element_type=f32) + b3_ref[...]       # (BB, H1)
        z = jnp.maximum(z, 0.0)

        # ---- Linear(256 -> 10) + Softmax. ------------------------------------
        logits = jnp.dot(z.astype(bf16), w4_ref[...],
                         preferred_element_type=f32) + b4_ref[...]  # (BB, NCLS)
        logits = logits - jnp.max(logits, axis=-1, keepdims=True)
        e = jnp.exp(logits)
        s = jnp.sum(e, axis=-1, keepdims=True)
        out_ref[0] = e * pl.reciprocal(s, approx=True)

    return kernel


def model_forward(token_ids, params, block_b=10):
    B, S = token_ids.shape
    assert S == SEQ, "Conv1d(50, ...) requires a token sequence length of 50"
    BB = B if B < block_b else block_b          # samples per grid step
    G = -(-B // BB)                             # grid steps
    Bp = G * BB

    ids = token_ids.astype(jnp.int32)
    if Bp != B:
        ids = jnp.pad(ids, ((0, Bp - B), (0, 0)))   # pad with valid id 0
    ids3 = ids.reshape(G, 1, BB * SEQ)

    def fullspec(shape):
        nd = len(shape)
        return pl.BlockSpec(shape, lambda i, nd=nd: (0,) * nd)

    out = pl.pallas_call(
        _make_kernel(BB),
        out_shape=jax.ShapeDtypeStruct((G, BB, NCLS), jnp.float32),
        grid=(G,),
        in_specs=[
            pl.BlockSpec((1, 1, BB * SEQ), lambda i: (i, 0, 0)),   # token ids
            fullspec((EMB, VOCAB)),                                 # embedding^T
            fullspec((3 * SEQ, C1)), fullspec((1, C1)),             # conv1 (fused taps)
            fullspec((C1, C2)),      fullspec((1, C2)),             # conv2 centre tap
            fullspec((1, C2)),       fullspec((1, C2)),             # BN scale / shift
            fullspec((C2, H1)),      fullspec((1, H1)),             # linear1
            fullspec((H1, NCLS)),    fullspec((1, NCLS)),           # linear2
        ],
        out_specs=pl.BlockSpec((1, BB, NCLS), lambda i: (i, 0, 0)),
        compiler_params=pltpu.CompilerParams(dimension_semantics=("parallel",)),
    )(ids3, params["table_t"], params["w1f"], params["b1"],
      params["w2c"], params["b2"], params["bn_scale"], params["bn_shift"],
      params["w3t"], params["b3"], params["w4t"], params["b4"])

    return out.reshape(Bp, NCLS)[:B]


def init_params(key):
    ks = jax.random.split(key, 9)
    f32 = jnp.float32
    bf16 = jnp.bfloat16

    # Embedding(200, 50): N(0, 1)
    embedding = jax.random.normal(ks[0], (VOCAB, EMB), f32)

    # Conv1d(50, 256, k=3): weight (out, in, k), U(-1/sqrt(in*k), +)
    k1 = 1.0 / (SEQ * 3.0) ** 0.5
    w1 = jax.random.uniform(ks[1], (C1, SEQ, 3), f32, -k1, k1)
    b1 = jax.random.uniform(ks[2], (C1,), f32, -k1, k1)

    # Conv1d(256, 50, k=3)
    k2 = 1.0 / (C1 * 3.0) ** 0.5
    w2 = jax.random.uniform(ks[3], (C2, C1, 3), f32, -k2, k2)
    b2 = jax.random.uniform(ks[4], (C2,), f32, -k2, k2)

    # Linear(50, 256), Linear(256, 10): weight (out, in)
    k3 = 1.0 / C2 ** 0.5
    w3 = jax.random.uniform(ks[5], (H1, C2), f32, -k3, k3)
    b3 = jax.random.uniform(ks[6], (H1,), f32, -k3, k3)
    k4 = 1.0 / H1 ** 0.5
    w4 = jax.random.uniform(ks[7], (NCLS, H1), f32, -k4, k4)
    b4 = jax.random.uniform(ks[8], (NCLS,), f32, -k4, k4)

    # BatchNorm1d(50) default params / running stats (eval mode), folded.
    gamma = jnp.ones((C2,), f32)
    beta = jnp.zeros((C2,), f32)
    mean = jnp.zeros((C2,), f32)
    var = jnp.ones((C2,), f32)
    scale = gamma * jax.lax.rsqrt(var + BN_EPS)
    shift = beta - mean * scale

    return {
        # embedding transposed: (emb_dim, vocab) so the one-hot gather is one matmul
        "table_t": embedding.T.astype(bf16),
        # conv1 repacked per tap as (in, out) and fused: rows = k*SEQ + c
        "w1f": jnp.transpose(w1, (2, 1, 0)).reshape(3 * SEQ, C1).astype(bf16),
        "b1": b1.reshape(1, C1),
        # conv2: only the centre tap touches data at pooled length 1
        "w2c": w2[:, :, 1].T.astype(bf16),
        "b2": b2.reshape(1, C2),
        "bn_scale": scale.reshape(1, C2),
        "bn_shift": shift.reshape(1, C2),
        "w3t": w3.T.astype(bf16),
        "b3": b3.reshape(1, H1),
        "w4t": w4.T.astype(bf16),
        "b4": b4.reshape(1, NCLS),
    }


def reference_forward(token_ids, params):
    """Plain-JAX reference mirroring the kernel's bf16 matmul operands."""
    f32 = jnp.float32
    bf16 = jnp.bfloat16
    table = params["table_t"].astype(f32).T                 # (VOCAB, EMB), bf16 values
    emb = table[token_ids]                                  # (B, SEQ, EMB)
    x = jnp.transpose(emb, (0, 2, 1))                       # (B, EMB, SEQ)
    xp = jnp.pad(x, ((0, 0), (1, 1), (0, 0)))
    xk = jnp.concatenate([xp[:, 0:EMB, :], xp[:, 1:EMB + 1, :], xp[:, 2:EMB + 2, :]],
                         axis=2)                            # (B, EMB, 3*SEQ)
    h = jnp.einsum("btk,ko->bto",
                   xk.astype(bf16).astype(f32), params["w1f"].astype(f32))
    pooled = jnp.max(h, axis=1)                             # (B, C1)
    m = jnp.maximum(pooled + params["b1"], 0.0)
    y = jnp.dot(m.astype(bf16).astype(f32), params["w2c"].astype(f32)) + params["b2"]
    y = y * params["bn_scale"] + params["bn_shift"]
    z = jnp.maximum(jnp.dot(y.astype(bf16).astype(f32),
                            params["w3t"].astype(f32)) + params["b3"], 0.0)
    logits = jnp.dot(z.astype(bf16).astype(f32),
                     params["w4t"].astype(f32)) + params["b4"]
    return jax.nn.softmax(logits, axis=-1)


if __name__ == "__main__":
    key = jax.random.PRNGKey(0)
    pkey, xkey, xkey2 = jax.random.split(key, 3)
    params = init_params(pkey)

    # Token ids: sequence length must be 50 (Conv1d(50,...) channel dim).
    token_ids = jax.random.randint(xkey, (2, SEQ), 0, VOCAB, dtype=jnp.int32)

    fwd = jax.jit(model_forward)
    probs = fwd(token_ids, params)
    jax.block_until_ready(probs)

    ref = reference_forward(token_ids, params)
    assert probs.shape == (2, NCLS)
    assert bool(jnp.all(jnp.isfinite(probs)))
    assert bool(jnp.allclose(jnp.sum(probs, axis=-1), 1.0, atol=2e-2))
    assert bool(jnp.allclose(probs, ref, atol=2e-2))

    # Second (still small) batch exercising multiple grid steps + padding.
    token_ids2 = jax.random.randint(xkey2, (13, SEQ), 0, VOCAB, dtype=jnp.int32)
    probs2 = fwd(token_ids2, params)
    jax.block_until_ready(probs2)
    ref2 = reference_forward(token_ids2, params)
    assert probs2.shape == (13, NCLS)
    assert bool(jnp.all(jnp.isfinite(probs2)))
    assert bool(jnp.allclose(probs2, ref2, atol=2e-2))

    print("KERNEL_OK")
</pallas_src>

<mosaic_0001>
module attributes {stable_mosaic.version = 11 : i64} {
  func.func @kernel(%arg0: i32, %arg1: memref<1x1x100xi32, #tpu.memory_space<vmem>>, %arg2: memref<50x200xbf16, #tpu.memory_space<vmem>>, %arg3: memref<150x256xbf16, #tpu.memory_space<vmem>>, %arg4: memref<1x256xf32, #tpu.memory_space<vmem>>, %arg5: memref<256x50xbf16, #tpu.memory_space<vmem>>, %arg6: memref<1x50xf32, #tpu.memory_space<vmem>>, %arg7: memref<1x50xf32, #tpu.memory_space<vmem>>, %arg8: memref<1x50xf32, #tpu.memory_space<vmem>>, %arg9: memref<50x256xbf16, #tpu.memory_space<vmem>>, %arg10: memref<1x256xf32, #tpu.memory_space<vmem>>, %arg11: memref<256x10xbf16, #tpu.memory_space<vmem>>, %arg12: memref<1x10xf32, #tpu.memory_space<vmem>>, %arg13: memref<1x2x10xf32, #tpu.memory_space<vmem>>) attributes {dimension_semantics = [#tpu.dimension_semantics<parallel>], iteration_bounds = array<i64: 1>, scalar_prefetch = 0 : i64, scratch_operands = 0 : i64, tpu.core_type = #tpu.core_type<tc>, window_params = [{transform_indices = @transform_0, window_bounds = array<i64: 1, 1, 100>}, {pipeline_mode = #tpu.pipeline_mode<synchronous>, transform_indices = @transform_1, window_bounds = array<i64: 50, 200>}, {pipeline_mode = #tpu.pipeline_mode<synchronous>, transform_indices = @transform_2, window_bounds = array<i64: 150, 256>}, {pipeline_mode = #tpu.pipeline_mode<synchronous>, transform_indices = @transform_3, window_bounds = array<i64: 1, 256>}, {pipeline_mode = #tpu.pipeline_mode<synchronous>, transform_indices = @transform_4, window_bounds = array<i64: 256, 50>}, {pipeline_mode = #tpu.pipeline_mode<synchronous>, transform_indices = @transform_5, window_bounds = array<i64: 1, 50>}, {pipeline_mode = #tpu.pipeline_mode<synchronous>, transform_indices = @transform_6, window_bounds = array<i64: 1, 50>}, {pipeline_mode = #tpu.pipeline_mode<synchronous>, transform_indices = @transform_7, window_bounds = array<i64: 1, 50>}, {pipeline_mode = #tpu.pipeline_mode<synchronous>, transform_indices = @transform_8, window_bounds = array<i64: 50, 256>}, {pipeline_mode = #tpu.pipeline_mode<synchronous>, transform_indices = @transform_9, window_bounds = array<i64: 1, 256>}, {pipeline_mode = #tpu.pipeline_mode<synchronous>, transform_indices = @transform_10, window_bounds = array<i64: 256, 10>}, {pipeline_mode = #tpu.pipeline_mode<synchronous>, transform_indices = @transform_11, window_bounds = array<i64: 1, 10>}, {transform_indices = @transform_12, window_bounds = array<i64: 1, 2, 10>}]} {
    %c0 = arith.constant 0 : index
    %c0_0 = arith.constant 0 : index
    %c0_1 = arith.constant 0 : index
    %0 = vector.load %arg1[%c0, %c0_0, %c0_1] : memref<1x1x100xi32, #tpu.memory_space<vmem>>, vector<1x1x100xi32>
    %1 = vector.shape_cast %0 : vector<1x1x100xi32> to vector<1x100xi32>
    %2 = tpu.iota {dimensions = array<i32: 0>} : vector<200x100xi32>
    %3 = vector.broadcast %1 : vector<1x100xi32> to vector<200x100xi32>
    %4 = arith.cmpi eq, %2, %3 : vector<200x100xi32>
    %5 = arith.extui %4 : vector<200x100xi1> to vector<200x100xi32>
    %6 = arith.sitofp %5 : vector<200x100xi32> to vector<200x100xf32>
    %7 = arith.truncf %6 : vector<200x100xf32> to vector<200x100xbf16>
    %c0_2 = arith.constant 0 : index
    %c0_3 = arith.constant 0 : index
    %8 = vector.load %arg2[%c0_2, %c0_3] : memref<50x200xbf16, #tpu.memory_space<vmem>>, vector<50x200xbf16>
    %cst = arith.constant dense<0.000000e+00> : vector<50x100xf32>
    %9 = tpu.matmul %8, %7, %cst {dimension_numbers = #tpu.dot_dimension_numbers<[1], [0], [0], [1], [0, 0, 1, 1], [], []>} : vector<50x200xbf16>, vector<200x100xbf16>, vector<50x100xf32> -> vector<50x100xf32>
    %10 = arith.truncf %9 : vector<50x100xf32> to vector<50x100xbf16>
    %cst_4 = arith.constant 0.000000e+00 : bf16
    %11 = vector.broadcast %cst_4 : bf16 to vector<1x100xbf16>
    %12 = vector.extract_strided_slice %10 {offsets = [0, 0], sizes = [49, 100], strides = [1, 1]} : vector<50x100xbf16> to vector<49x100xbf16>
    %13 = tpu.concatenate %11, %12 in 0 : vector<1x100xbf16>, vector<49x100xbf16> -> vector<50x100xbf16>
    %14 = vector.extract_strided_slice %10 {offsets = [1, 0], sizes = [49, 100], strides = [1, 1]} : vector<50x100xbf16> to vector<49x100xbf16>
    %15 = tpu.concatenate %14, %11 in 0 : vector<49x100xbf16>, vector<1x100xbf16> -> vector<50x100xbf16>
    %16 = vector.extract_strided_slice %13 {offsets = [0, 0], sizes = [50, 50], strides = [1, 1]} : vector<50x100xbf16> to vector<50x50xbf16>
    %17 = vector.extract_strided_slice %13 {offsets = [0, 50], sizes = [50, 50], strides = [1, 1]} : vector<50x100xbf16> to vector<50x50xbf16>
    %18 = tpu.concatenate %16, %17 in 0 : vector<50x50xbf16>, vector<50x50xbf16> -> vector<100x50xbf16>
    %19 = vector.extract_strided_slice %10 {offsets = [0, 0], sizes = [50, 50], strides = [1, 1]} : vector<50x100xbf16> to vector<50x50xbf16>
    %20 = vector.extract_strided_slice %10 {offsets = [0, 50], sizes = [50, 50], strides = [1, 1]} : vector<50x100xbf16> to vector<50x50xbf16>
    %21 = tpu.concatenate %19, %20 in 0 : vector<50x50xbf16>, vector<50x50xbf16> -> vector<100x50xbf16>
    %22 = vector.extract_strided_slice %15 {offsets = [0, 0], sizes = [50, 50], strides = [1, 1]} : vector<50x100xbf16> to vector<50x50xbf16>
    %23 = vector.extract_strided_slice %15 {offsets = [0, 50], sizes = [50, 50], strides = [1, 1]} : vector<50x100xbf16> to vector<50x50xbf16>
    %24 = tpu.concatenate %22, %23 in 0 : vector<50x50xbf16>, vector<50x50xbf16> -> vector<100x50xbf16>
    %25 = tpu.concatenate %18, %21, %24 in 1 : vector<100x50xbf16>, vector<100x50xbf16>, vector<100x50xbf16> -> vector<100x150xbf16>
    %c0_5 = arith.constant 0 : index
    %c0_6 = arith.constant 0 : index
    %26 = vector.load %arg3[%c0_5, %c0_6] : memref<150x256xbf16, #tpu.memory_space<vmem>>, vector<150x256xbf16>
    %cst_7 = arith.constant dense<0.000000e+00> : vector<100x256xf32>
    %27 = tpu.matmul %25, %26, %cst_7 {dimension_numbers = #tpu.dot_dimension_numbers<[1], [0], [0], [1], [0, 0, 1, 1], [], []>} : vector<100x150xbf16>, vector<150x256xbf16>, vector<100x256xf32> -> vector<100x256xf32>
    %28 = vector.extract_strided_slice %27 {offsets = [0, 0], sizes = [50, 256], strides = [1, 1]} : vector<100x256xf32> to vector<50x256xf32>
    %cst_8 = arith.constant dense<0xFF800000> : vector<256xf32>
    %29 = vector.multi_reduction <maximumf>, %28, %cst_8 [0] : vector<50x256xf32> to vector<256xf32>
    %30 = vector.shape_cast %29 : vector<256xf32> to vector<1x256xf32>
    %31 = vector.extract_strided_slice %27 {offsets = [50, 0], sizes = [50, 256], strides = [1, 1]} : vector<100x256xf32> to vector<50x256xf32>
    %cst_9 = arith.constant dense<0xFF800000> : vector<256xf32>
    %32 = vector.multi_reduction <maximumf>, %31, %cst_9 [0] : vector<50x256xf32> to vector<256xf32>
    %33 = vector.shape_cast %32 : vector<256xf32> to vector<1x256xf32>
    %34 = tpu.concatenate %30, %33 in 0 : vector<1x256xf32>, vector<1x256xf32> -> vector<2x256xf32>
    %c0_10 = arith.constant 0 : index
    %c0_11 = arith.constant 0 : index
    %35 = vector.load %arg4[%c0_10, %c0_11] : memref<1x256xf32, #tpu.memory_space<vmem>>, vector<1x256xf32>
    %36 = vector.broadcast %35 : vector<1x256xf32> to vector<2x256xf32>
    %37 = arith.addf %34, %36 : vector<2x256xf32>
    %cst_12 = arith.constant 0.000000e+00 : f32
    %38 = vector.broadcast %cst_12 : f32 to vector<2x256xf32>
    %39 = arith.maximumf %37, %38 : vector<2x256xf32>
    %40 = arith.truncf %39 : vector<2x256xf32> to vector<2x256xbf16>
    %c0_13 = arith.constant 0 : index
    %c0_14 = arith.constant 0 : index
    %41 = vector.load %arg5[%c0_13, %c0_14] : memref<256x50xbf16, #tpu.memory_space<vmem>>, vector<256x50xbf16>
    %cst_15 = arith.constant dense<0.000000e+00> : vector<2x50xf32>
    %42 = tpu.matmul %40, %41, %cst_15 {dimension_numbers = #tpu.dot_dimension_numbers<[1], [0], [0], [1], [0, 0, 1, 1], [], []>} : vector<2x256xbf16>, vector<256x50xbf16>, vector<2x50xf32> -> vector<2x50xf32>
    %c0_16 = arith.constant 0 : index
    %c0_17 = arith.constant 0 : index
    %43 = vector.load %arg6[%c0_16, %c0_17] : memref<1x50xf32, #tpu.memory_space<vmem>>, vector<1x50xf32>
    %44 = vector.broadcast %43 : vector<1x50xf32> to vector<2x50xf32>
    %45 = arith.addf %42, %44 : vector<2x50xf32>
    %c0_18 = arith.constant 0 : index
    %c0_19 = arith.constant 0 : index
    %46 = vector.load %arg7[%c0_18, %c0_19] : memref<1x50xf32, #tpu.memory_space<vmem>>, vector<1x50xf32>
    %47 = vector.broadcast %46 : vector<1x50xf32> to vector<2x50xf32>
    %48 = arith.mulf %45, %47 : vector<2x50xf32>
    %c0_20 = arith.constant 0 : index
    %c0_21 = arith.constant 0 : index
    %49 = vector.load %arg8[%c0_20, %c0_21] : memref<1x50xf32, #tpu.memory_space<vmem>>, vector<1x50xf32>
    %50 = vector.broadcast %49 : vector<1x50xf32> to vector<2x50xf32>
    %51 = arith.addf %48, %50 : vector<2x50xf32>
    %52 = arith.truncf %51 : vector<2x50xf32> to vector<2x50xbf16>
    %c0_22 = arith.constant 0 : index
    %c0_23 = arith.constant 0 : index
    %53 = vector.load %arg9[%c0_22, %c0_23] : memref<50x256xbf16, #tpu.memory_space<vmem>>, vector<50x256xbf16>
    %cst_24 = arith.constant dense<0.000000e+00> : vector<2x256xf32>
    %54 = tpu.matmul %52, %53, %cst_24 {dimension_numbers = #tpu.dot_dimension_numbers<[1], [0], [0], [1], [0, 0, 1, 1], [], []>} : vector<2x50xbf16>, vector<50x256xbf16>, vector<2x256xf32> -> vector<2x256xf32>
    %c0_25 = arith.constant 0 : index
    %c0_26 = arith.constant 0 : index
    %55 = vector.load %arg10[%c0_25, %c0_26] : memref<1x256xf32, #tpu.memory_space<vmem>>, vector<1x256xf32>
    %56 = vector.broadcast %55 : vector<1x256xf32> to vector<2x256xf32>
    %57 = arith.addf %54, %56 : vector<2x256xf32>
    %cst_27 = arith.constant 0.000000e+00 : f32
    %58 = vector.broadcast %cst_27 : f32 to vector<2x256xf32>
    %59 = arith.maximumf %57, %58 : vector<2x256xf32>
    %60 = arith.truncf %59 : vector<2x256xf32> to vector<2x256xbf16>
    %c0_28 = arith.constant 0 : index
    %c0_29 = arith.constant 0 : index
    %61 = vector.load %arg11[%c0_28, %c0_29] : memref<256x10xbf16, #tpu.memory_space<vmem>>, vector<256x10xbf16>
    %cst_30 = arith.constant dense<0.000000e+00> : vector<2x10xf32>
    %62 = tpu.matmul %60, %61, %cst_30 {dimension_numbers = #tpu.dot_dimension_numbers<[1], [0], [0], [1], [0, 0, 1, 1], [], []>} : vector<2x256xbf16>, vector<256x10xbf16>, vector<2x10xf32> -> vector<2x10xf32>
    %c0_31 = arith.constant 0 : index
    %c0_32 = arith.constant 0 : index
    %63 = vector.load %arg12[%c0_31, %c0_32] : memref<1x10xf32, #tpu.memory_space<vmem>>, vector<1x10xf32>
    %64 = vector.broadcast %63 : vector<1x10xf32> to vector<2x10xf32>
    %65 = arith.addf %62, %64 : vector<2x10xf32>
    %cst_33 = arith.constant dense<0xFF800000> : vector<2xf32>
    %66 = vector.multi_reduction <maximumf>, %65, %cst_33 [1] : vector<2x10xf32> to vector<2xf32>
    %67 = vector.shape_cast %66 : vector<2xf32> to vector<2x1xf32>
    %68 = vector.broadcast %67 : vector<2x1xf32> to vector<2x10xf32>
    %69 = arith.subf %65, %68 : vector<2x10xf32>
    %70 = math.exp %69 : vector<2x10xf32>
    %cst_34 = arith.constant dense<0.000000e+00> : vector<2xf32>
    %71 = vector.multi_reduction <add>, %70, %cst_34 [1] : vector<2x10xf32> to vector<2xf32>
    %72 = vector.shape_cast %71 : vector<2xf32> to vector<2x1xf32>
    %73 = tpu.reciprocal %72 {approx = true} : vector<2x1xf32> -> vector<2x1xf32>
    %74 = vector.broadcast %73 : vector<2x1xf32> to vector<2x10xf32>
    %75 = arith.mulf %70, %74 : vector<2x10xf32>
    %c0_35 = arith.constant 0 : index
    %c0_36 = arith.constant 0 : index
    %c0_37 = arith.constant 0 : index
    %76 = vector.load %arg13[%c0_35, %c0_36, %c0_37] : memref<1x2x10xf32, #tpu.memory_space<vmem>>, vector<1x2x10xf32>
    %77 = vector.shape_cast %76 : vector<1x2x10xf32> to vector<2x10xf32>
    %78 = vector.shape_cast %75 : vector<2x10xf32> to vector<1x2x10xf32>
    tpu.vector_store %arg13[%c0_35, %c0_36, %c0_37], %78 {strides = array<i32>} : memref<1x2x10xf32, #tpu.memory_space<vmem>>, vector<1x2x10xf32>,
    return
  }
  func.func @transform_0(%arg0: i32) -> (i32, i32, i32) {
    %c0_i32 = arith.constant 0 : i32
    %c0_i32_0 = arith.constant 0 : i32
    %c0_i32_1 = arith.constant 0 : i32
    return %arg0, %c0_i32, %c0_i32_0 : i32, i32, i32
  }
  func.func @transform_1(%arg0: i32) -> (i32, i32) {
    %c0_i32 = arith.constant 0 : i32
    %c0_i32_0 = arith.constant 0 : i32
    %c0_i32_1 = arith.constant 0 : i32
    return %c0_i32, %c0_i32_0 : i32, i32
  }
  func.func @transform_2(%arg0: i32) -> (i32, i32) {
    %c0_i32 = arith.constant 0 : i32
    %c0_i32_0 = arith.constant 0 : i32
    %c0_i32_1 = arith.constant 0 : i32
    return %c0_i32, %c0_i32_0 : i32, i32
  }
  func.func @transform_3(%arg0: i32) -> (i32, i32) {
    %c0_i32 = arith.constant 0 : i32
    %c0_i32_0 = arith.constant 0 : i32
    %c0_i32_1 = arith.constant 0 : i32
    return %c0_i32, %c0_i32_0 : i32, i32
  }
  func.func @transform_4(%arg0: i32) -> (i32, i32) {
    %c0_i32 = arith.constant 0 : i32
    %c0_i32_0 = arith.constant 0 : i32
    %c0_i32_1 = arith.constant 0 : i32
    return %c0_i32, %c0_i32_0 : i32, i32
  }
  func.func @transform_5(%arg0: i32) -> (i32, i32) {
    %c0_i32 = arith.constant 0 : i32
    %c0_i32_0 = arith.constant 0 : i32
    %c0_i32_1 = arith.constant 0 : i32
    return %c0_i32, %c0_i32_0 : i32, i32
  }
  func.func @transform_6(%arg0: i32) -> (i32, i32) {
    %c0_i32 = arith.constant 0 : i32
    %c0_i32_0 = arith.constant 0 : i32
    %c0_i32_1 = arith.constant 0 : i32
    return %c0_i32, %c0_i32_0 : i32, i32
  }
  func.func @transform_7(%arg0: i32) -> (i32, i32) {
    %c0_i32 = arith.constant 0 : i32
    %c0_i32_0 = arith.constant 0 : i32
    %c0_i32_1 = arith.constant 0 : i32
    return %c0_i32, %c0_i32_0 : i32, i32
  }
  func.func @transform_8(%arg0: i32) -> (i32, i32) {
    %c0_i32 = arith.constant 0 : i32
    %c0_i32_0 = arith.constant 0 : i32
    %c0_i32_1 = arith.constant 0 : i32
    return %c0_i32, %c0_i32_0 : i32, i32
  }
  func.func @transform_9(%arg0: i32) -> (i32, i32) {
    %c0_i32 = arith.constant 0 : i32
    %c0_i32_0 = arith.constant 0 : i32
    %c0_i32_1 = arith.constant 0 : i32
    return %c0_i32, %c0_i32_0 : i32, i32
  }
  func.func @transform_10(%arg0: i32) -> (i32, i32) {
    %c0_i32 = arith.constant 0 : i32
    %c0_i32_0 = arith.constant 0 : i32
    %c0_i32_1 = arith.constant 0 : i32
    return %c0_i32, %c0_i32_0 : i32, i32
  }
  func.func @transform_11(%arg0: i32) -> (i32, i32) {
    %c0_i32 = arith.constant 0 : i32
    %c0_i32_0 = arith.constant 0 : i32
    %c0_i32_1 = arith.constant 0 : i32
    return %c0_i32, %c0_i32_0 : i32, i32
  }
  func.func @transform_12(%arg0: i32) -> (i32, i32, i32) {
    %c0_i32 = arith.constant 0 : i32
    %c0_i32_0 = arith.constant 0 : i32
    %c0_i32_1 = arith.constant 0 : i32
    return %arg0, %c0_i32, %c0_i32_0 : i32, i32, i32
  }
}

</mosaic_0001>

<bundles_post_ra>
// kernel: model_forward.1
= control target key start
LH: loop header
LB: loop body
LE: loop exit
PB: predicated region body
PF: predicated region fallthrough
CT: control target
= control target key end

     0   :  { %v44_v0 = vlaneseq  ;;  %s2321_s0 = inlined_call_operand.vmem [shape: s32[1,1,100], index: 0, kind: input, shape index: {}]   ;;  %s2322_s1 = inlined_call_operand.vmem [shape: bf16[50,200], index: 1, kind: input, shape index: {}]   ;;  %s2323_s2 = inlined_call_operand.vmem [shape: bf16[150,256], index: 2, kind: input, shape index: {}]   ;;  %s2324_s3 = inlined_call_operand.vmem [shape: f32[1,256], index: 3, kind: input, shape index: {}]   ;;  %s2325_s4 = inlined_call_operand.vmem [shape: bf16[256,50], index: 4, kind: input, shape index: {}]   ;;  %s2326_s5 = inlined_call_operand.vmem [shape: f32[1,50], index: 5, kind: input, shape index: {}]   ;;  %s2327_s6 = inlined_call_operand.vmem [shape: f32[1,50], index: 6, kind: input, shape index: {}]   ;;  %s2328_s7 = inlined_call_operand.vmem [shape: f32[1,50], index: 7, kind: input, shape index: {}]   ;;  %s2329_s8 = inlined_call_operand.vmem [shape: bf16[50,256], index: 8, kind: input, shape index: {}]   ;;  %s2330_s9 = inlined_call_operand.vmem [shape: f32[1,256], index: 9, kind: input, shape index: {}]   ;;  %s2331_s10 = inlined_call_operand.vmem [shape: bf16[256,10], index: 10, kind: input, shape index: {}]   ;;  %s2332_s11 = inlined_call_operand.vmem [shape: f32[1,10], index: 11, kind: input, shape index: {}]   ;;  %s2333_s12 = inlined_call_operand.hbm [shape: f32[1,2,10], index: 12, kind: output, shape index: {}]  }
   0x1   :  { %v1788_v1 = vld [vmem:[%s2321_s0] ss:$0 sm:$0xff] }
   0x2   :  { %v1790_v2 = vshrl.u32 %v44_v0, 7 }
   0x3   :  { %17 = vsyncpa [#allocation3], 0  ;;  %v1714_v12 = vmov 1.0|1.0   ;;  %v1715_v13 = vmov 0.0   ;;  %vm212_vm6 = vcmask 1043456  }
   0x4   :  { %v59_v3 = vadd.s32 112, %v1790_v2  ;;  %v60_v4 = vadd.s32 120, %v1790_v2  ;;  %v57_v5 = vadd.s32 96, %v1790_v2  ;;  %v58_v6 = vadd.s32 104, %v1790_v2  ;;  %v1611_v31 = vld [vmem:[%s2322_s1 + $0x4] sm:$0xf] }
   0x5   :  { %v69_v7 = vadd.s32 192, %v1790_v2  ;;  %v55_v8 = vadd.s32 80, %v1790_v2  ;;  %v56_v9 = vadd.s32 88, %v1790_v2  ;;  %v67_v10 = vadd.s32 176, %v1790_v2  ;;  %v1323_v32 = vld [vmem:[%s2322_s1 + $0x8] sm:$0xf0] }
   0x6   :  { %vm85_vm0 = vcmp.eq.s32.totalorder %v59_v3, %v1788_v1  ;;  %vm86_vm1 = vcmp.eq.s32.totalorder %v60_v4, %v1788_v1  ;;  %vm83_vm2 = vcmp.eq.s32.totalorder %v57_v5, %v1788_v1  ;;  %vm84_vm3 = vcmp.eq.s32.totalorder %v58_v6, %v1788_v1  ;;  %v1321_v35 = vld [vmem:[%s2322_s1] sm:$0xf]  ;;  %v1612_v36 = vld [vmem:[%s2322_s1 + $0x4] sm:$0xf0]  ;;  %v1613_v38 = vld [vmem:[%s2322_s1 + $0x14] sm:$0xf] }
   0x7   :  { %vm1343_vm4 = vmpackc.low %vm86_vm1, %vm85_vm0  ;;  %vm95_vm5 = vcmp.eq.s32.totalorder %v69_v7, %v1788_v1  ;;  %v68_v11 = vadd.s32 184, %v1790_v2  ;;  %vm81_vm7 = vcmp.eq.s32.totalorder %v55_v8, %v1788_v1  ;;  %vm82_vm9 = vcmp.eq.s32.totalorder %v56_v9, %v1788_v1  ;;  %v1331_v39 = vld [vmem:[%s2322_s1 + $0x18] sm:$0xf0]  ;;  %v1329_v41 = vld [vmem:[%s2322_s1 + $0x10] sm:$0xf]  ;;  %s1717_s29 = smov 78  }
   0x8   :  { %1344 = vmatpush.bf16.msk.msra.mxu0 %vm1343_vm4, %v1714_v12  ;;  %v1318_v14 = vsel %vm95_vm5, 1.0, %v1715_v13  ;;  %vm1345_vm8 = vmpackc.low %vm84_vm3, %vm83_vm2  ;;  %v53_v16 = vadd.s32 64, %v1790_v2  ;;  %v54_v17 = vadd.s32 72, %v1790_v2  ;;  %vm93_vm10 = vcmp.eq.s32.totalorder %v67_v10, %v1788_v1  ;;  %v1614_v42 = vld [vmem:[%s2322_s1 + $0x14] sm:$0xf0]  ;;  %s1718_s30 = smov 100  }
   0x9   :  { %v158_v15 = vpack.c.bf16 %v1318_v14, %v1318_v14  ;;  %vm94_vm11 = vcmp.eq.s32.totalorder %v68_v11, %v1788_v1  ;;  %v65_v18 = vadd.s32 160, %v1790_v2  ;;  %v66_v19 = vadd.s32 168, %v1790_v2  ;;  %vm1347_vm12 = vmpackc.low %vm82_vm9, %vm81_vm7  ;;  %v1615_v44 = vld [vmem:[%s2322_s1 + $0x24] sm:$0xf]  ;;  %v1339_v45 = vld [vmem:[%s2322_s1 + $0x28] sm:$0xf0] }
   0xa   :  { %vm1359_vm13 = vmpackc.low %vm94_vm11, %vm93_vm10  ;;  %vm79_vm14 = vcmp.eq.s32.totalorder %v53_v16, %v1788_v1  ;;  %vm80_vm15 = vcmp.eq.s32.totalorder %v54_v17, %v1788_v1  ;;  %v51_v21 = vadd.s32 48, %v1790_v2  ;;  %v52_v22 = vadd.s32 56, %v1790_v2  ;;  %v1337_v47 = vld [vmem:[%s2322_s1 + $0x20] sm:$0xf]  ;;  %v1616_v48 = vld [vmem:[%s2322_s1 + $0x24] sm:$0xf0] }
   0xb   :  { %v214_v20 = vsel %vm212_vm6, %v158_v15, 0  ;;  %vm91_vm0 = vcmp.eq.s32.totalorder %v65_v18, %v1788_v1  ;;  %vm92_vm1 = vcmp.eq.s32.totalorder %v66_v19, %v1788_v1  ;;  %v63_v23 = vadd.s32 144, %v1790_v2  ;;  %vm1349_vm2 = vmpackc.low %vm80_vm15, %vm79_vm14  ;;  %v165_v50 = vld [vmem:[%s2322_s1 + $0x30] sm:$0x11]  ;;  %s1716_s1 = smov 50   ;;  %s1285_s21 = sshll.u32 %s2333_s12, 4  ;;  %s1286_s21 = int_to_ptr.hbm [resolvable:$true] %s1285_s21 }
   0xc   :  { %1346 = vmatpush.bf16.msk.msra.mxu0 %vm1345_vm8, %v1714_v12  ;;  %247 = vmatpush.bf16.msra.mxu1 %v214_v20  ;;  %v64_v24 = vadd.s32 152, %v1790_v2  ;;  %vm1361_vm3 = vmpackc.low %vm92_vm1, %vm91_vm0  ;;  %vm77_vm4 = vcmp.eq.s32.totalorder %v51_v21, %v1788_v1  ;;  %vm78_vm5 = vcmp.eq.s32.totalorder %v52_v22, %v1788_v1  ;;  %v49_v25 = vadd.s32 32, %v1790_v2 }
   0xd   :  { %v50_v26 = vadd.s32 40, %v1790_v2  ;;  %vm89_vm7 = vcmp.eq.s32.totalorder %v63_v23, %v1788_v1  ;;  %v61_v27 = vadd.s32 128, %v1790_v2  ;;  %v62_v28 = vadd.s32 136, %v1790_v2  ;;  %vm1351_vm9 = vmpackc.low %vm78_vm5, %vm77_vm4 }
   0xe   :  { %vm90_vm8 = vcmp.eq.s32.totalorder %v64_v24, %v1788_v1  ;;  %vm75_vm11 = vcmp.eq.s32.totalorder %v49_v25, %v1788_v1  ;;  %v47_v29 = vadd.s32 16, %v1790_v2  ;;  %v48_v30 = vadd.s32 24, %v1790_v2  ;;  %v1630_v24 = vld [vmem:[%s2323_s2 + $0x64] sm:$0xf0] }
   0xf   :  { %vm1363_vm10 = vmpackc.low %vm90_vm8, %vm89_vm7  ;;  %vm88_vm14 = vcmp.eq.s32.totalorder %v62_v28, %v1788_v1  ;;  %v46_v33 = vadd.s32 8, %v1790_v2  ;;  %v1326_v34 = vor.u32 %v1611_v31, %v1323_v32  ;;  %vm71_vm5 = vcmp.eq.s32.totalorder %v1790_v2, %v1788_v1 }
  0x10   :  { %1348 = vmatpush.bf16.msk.msra.mxu0 %vm1347_vm12, %v1714_v12  ;;  %1360 = vmatpush.bf16.msk.msra.mxu1 %vm1359_vm13, %v1714_v12  ;;  %vm76_vm12 = vcmp.eq.s32.totalorder %v50_v26, %v1788_v1  ;;  %vm87_vm13 = vcmp.eq.s32.totalorder %v61_v27, %v1788_v1  ;;  %vm73_vm1 = vcmp.eq.s32.totalorder %v47_v29, %v1788_v1  ;;  %v186_v51 = vunpack.c.h.b16 %v165_v50 }
  0x11   :  { %vm1353_vm15 = vmpackc.low %vm76_vm12, %vm75_vm11  ;;  %vm72_vm7 = vcmp.eq.s32.totalorder %v46_v33, %v1788_v1  ;;  %v1322_v37 = vor.u32 %v1612_v36, %v1321_v35  ;;  %v1334_v40 = vor.u32 %v1613_v38, %v1331_v39  ;;  %v1330_v43 = vor.u32 %v1614_v42, %v1329_v41 }
  0x12   :  { %vm1365_vm0 = vmpackc.low %vm88_vm14, %vm87_vm13  ;;  %v1342_v46 = vor.u32 %v1615_v44, %v1339_v45  ;;  %v1338_v49 = vor.u32 %v1616_v48, %v1337_v47  ;;  %v194_v52 = vpack.c.b16 %v186_v51, %v186_v51  ;;  %v185_v53 = vunpack.c.l.b16 %v165_v50  ;;  %v1632_v47 = vld [vmem:[%s2323_s2 + $0x74] sm:$0xf0]  ;;  %v1631_v48 = vld [vmem:[%s2323_s2 + $0x74] sm:$0xf] }
  0x13   :  { %vm1357_vm8 = vmpackc.low %vm72_vm7, %vm71_vm5  ;;  %vm329_vm11 = vsmask.f32 7424  ;;  %v1431_v51 = vld [vmem:[%s2323_s2 + $0x78] sm:$0xf0]  ;;  %vm602_vm13 = vcmask 1042432   ;;  %vm587_vm14 = vcmask 179200  }
  0x14   :  { %1350 = vmatpush.bf16.msk.msra.mxu0 %vm1349_vm2, %v1714_v12  ;;  %1362 = vmatpush.bf16.msk.msra.mxu1 %vm1361_vm3, %v1714_v12  ;;  %vm74_vm2 = vcmp.eq.s32.totalorder %v48_v30, %v1788_v1  ;;  %vm199_vm3 = vcmask 588800   ;;  %v193_v54 = vpack.c.b16 %v185_v53, %v185_v53 }
  0x15   :  { %vm1355_vm4 = vmpackc.low %vm74_vm2, %vm73_vm1  ;;  %vm785_vm1 = vcmask 1041408   ;;  %vm808_vm2 = vcmask 1047554  }
  0x18   :  { %1352 = vmatpush.bf16.msk.msra.mxu0 %vm1351_vm9, %v1714_v12  ;;  %1364 = vmatpush.bf16.msk.msra.mxu1 %vm1363_vm10, %v1714_v12  ;;  %vm326_vm9 = vcmask 1040384   ;;  %vm297_vm10 = vsmask.f32 256 }
  0x19   :  { %vm1908_vm12 = vmand %vm326_vm9, %vm297_vm10 }
  0x1c   :  { %1354 = vmatpush.bf16.msk.msra.mxu0 %vm1353_vm15, %v1714_v12  ;;  %1366 = vmatpush.bf16.msk.msra.mxu1 %vm1365_vm0, %v1714_v12  ;;  %vm430_vm15 = vcmask 408576   ;;  %vm451_vm0 = vcmask 818176  }
  0x1f   :  { %1367 = vmatmul.msk.bf16.vlgmr.msra.gmra.mxu1 %vm199_vm3, %v1326_v34 }
  0x20   :  { %1356 = vmatpush.bf16.msk.msra.mxu0 %vm1355_vm4, %v1714_v12 }
  0x24   :  { %1358 = vmatpush.bf16.msk.msra.mxu0 %vm1357_vm8, %v1714_v12 }
  0x27   :  { %224 = vmatmul.bf16.vlgmr.msra.gmra.mxu0 %v1322_v37 }
  0x2f   :  { %1368 = vmatmul.msk.bf16.gmra.mxu1 %vm199_vm3, %v1334_v40 }
  0x37   :  { %229 = vmatmul.bf16.gmra.mxu0 %v1330_v43 }
  0x3f   :  { %1369 = vmatmul.msk.bf16.gmra.mxu1 %vm199_vm3, %v1342_v46  ;;  %v1429_v46 = vld [vmem:[%s2323_s2 + $0x70] sm:$0xf] }
  0x40   :  { %v1430_v50 = vor.u32 %v1632_v47, %v1429_v46  ;;  %v1623_v46 = vld [vmem:[%s2323_s2 + $0x34] sm:$0xf] }
  0x42   :  { %609 = vmatpush.bf16.msra.mxu2 %v1430_v50  ;;  %v1622_v50 = vld [vmem:[%s2323_s2 + $0x24] sm:$0xf0] }
  0x47   :  { %234 = vmatmul.bf16.gmra.mxu0 %v1338_v49 }
  0x4f   :  { %1370 = vmatmul.msk.bf16.gmra.mxu1 %vm199_vm3, %v194_v52 }
  0x57   :  { %239 = vmatmul.bf16.gmra.mxu0 %v193_v54  ;;  %v1434_v54 = vor.u32 %v1631_v48, %v1431_v51  ;;  %v1399_v48 = vld [vmem:[%s2323_s2 + $0x38] sm:$0xf0] }
  0x58   :  { %v1402_v51 = vor.u32 %v1623_v46, %v1399_v48 }
  0x59   :  { %695 = vmatpush.bf16.msrb.mxu1 %v1434_v54 }
  0x9c   :  { %v253_v55 = vpop.f32.mrf.mxu1 }
  0xa4   :  { %v225_v56 = vpop.f32.mrf.mxu0  ;;  %v255_v57 = vpop.f32.mrf.mxu1 }
  0xa5   :  { %v254_v58 = vadd.f32 %v253_v55, %v225_v56 }
  0xa7   :  { %v272_v61 = vpack.c.bf16 %v254_v58, %v254_v58 }
  0xa9   :  { %v286_v0 = vunpack.c.l.b16 %v272_v61 }
  0xac   :  { %v227_v59 = vpop.f32.mrf.mxu0  ;;  %v258_v60 = vpop.f32.mrf.mxu1 }
  0xad   :  { %v256_v62 = vadd.f32 %v255_v57, %v227_v59 }
  0xaf   :  { %v273_v63 = vpack.c.bf16 %v256_v62, %v256_v62 }
  0xb1   :  { %v287_v1 = vunpack.c.l.b16 %v273_v63 }
  0xb3   :  { %v293_v2 = vpack.c.b16 %v287_v1, %v286_v0 }
  0xb4   :  { %v230_v3 = vpop.f32.mrf.mxu0  ;;  %v260_v4 = vpop.f32.mrf.mxu1 }
  0xb5   :  { %401 = vrot.lane.b32.xlu0 %v293_v2, %s1716_s1  ;;  %v364_v5 = vrot.slane %v293_v2, 7  ;;  %v259_v6 = vadd.f32 %v258_v60, %v230_v3  ;;  %v299_v11 = vshrl.u32 %v293_v2, 16  ;;  %v302_v14 = vshll.u32 %v293_v2, 16 }
  0xb7   :  { %371 = vrot.lane.b32.xlu1 %v364_v5, %s1717_s29  ;;  %v274_v7 = vpack.c.bf16 %v259_v6, %v259_v6  ;;  %v301_v16 = vrot.slane %v299_v11, 7  ;;  %v330_v18 = vrot.slane %v302_v14, 1 }
  0xb9   :  { %v288_v12 = vunpack.c.l.b16 %v274_v7  ;;  %v304_v23 = vor.u32 %v302_v14, %v301_v16  ;;  %v331_v26 = vor.u32 %v330_v18, %v299_v11 }
  0xbb   :  { %v1915_v30 = vsel %vm1908_vm12, 0, %v304_v23  ;;  %v1421_v23 = vld [vmem:[%s2323_s2 + $0x60] sm:$0xf] }
  0xbc   :  { %v232_v8 = vpop.f32.mrf.mxu0  ;;  %v263_v9 = vpop.f32.mrf.mxu1  ;;  %v345_v37 = vrot.slane %v1915_v30, 7 }
  0xbd   :  { %v261_v10 = vadd.f32 %v260_v4, %v232_v8 }
  0xbf   :  { %v275_v13 = vpack.c.bf16 %v261_v10, %v261_v10 }
  0xc1   :  { %v289_v15 = vunpack.c.l.b16 %v275_v13 }
  0xc3   :  { %v1900_v17 = vpack.c.b16 %v289_v15, %v288_v12 }
  0xc4   :  { %v235_v19 = vpop.f32.mrf.mxu0  ;;  %v265_v20 = vpop.f32.mrf.mxu1 }
  0xc5   :  { %403 = vrot.lane.b32.xlu2 %v1900_v17, %s1716_s1  ;;  %v309_v21 = vshll.u32 %v1900_v17, 16  ;;  %v306_v22 = vshrl.u32 %v1900_v17, 16  ;;  %v264_v25 = vadd.f32 %v263_v9, %v235_v19  ;;  %v365_v40 = vrot.slane %v1900_v17, 7 }
  0xc7   :  { %v332_v27 = vrot.slane %v309_v21, 1  ;;  %v308_v28 = vrot.slane %v306_v22, 7  ;;  %v276_v33 = vpack.c.bf16 %v264_v25, %v264_v25  ;;  %v366_v45 = vsel %vm326_vm9, %v364_v5, %v365_v40  ;;  %v1629_v25 = vld [vmem:[%s2323_s2 + $0x64] sm:$0xf] }
  0xc9   :  { %v333_v29 = vsel %vm329_vm11, %v331_v26, %v332_v27  ;;  %v311_v31 = vor.u32 %v309_v21, %v308_v28  ;;  %v290_v42 = vunpack.c.l.b16 %v276_v33  ;;  %v334_v57 = vor.u32 %v332_v27, %v306_v22  ;;  %v1423_v27 = vld [vmem:[%s2323_s2 + $0x68] sm:$0xf0]  ;;  %v1415_v33 = vld [vmem:[%s2323_s2 + $0x58] sm:$0xf0] }
  0xca   :  { %416 = vrot.lane.b32.xlu0 %v333_v29, %s1718_s30  ;;  %v382_v32 = vrot.slane %v333_v29, 7  ;;  %v1422_v26 = vor.u32 %v1630_v24, %v1421_v23  ;;  %v1628_v29 = vld [vmem:[%s2323_s2 + $0x54] sm:$0xf0] }
  0xcb   :  { %v1919_v34 = vsel %vm297_vm10, %v301_v16, %v311_v31  ;;  %v1426_v31 = vor.u32 %v1629_v25, %v1423_v27 }
  0xcc   :  { %389 = vrot.lane.b32.xlu1 %v382_v32, %s1717_s29  ;;  %v237_v35 = vpop.f32.mrf.mxu0  ;;  %v268_v36 = vpop.f32.mrf.mxu1  ;;  %v346_v38 = vrot.slane %v1919_v34, 7  ;;  %610 = vmatpush.bf16.msra.mxu2 %v1422_v26 }
  0xcd   :  { %v266_v39 = vadd.f32 %v265_v20, %v237_v35  ;;  %696 = vmatpush.bf16.msrb.mxu1 %v1426_v31 }
  0xce   :  { %v1926_v41 = vsel %vm326_vm9, %v345_v37, %v346_v38 }
  0xcf   :  { %v277_v43 = vpack.c.bf16 %v266_v39, %v266_v39  ;;  %v1625_v39 = vld [vmem:[%s2323_s2 + $0x44] sm:$0xf] }
  0xd1   :  { %v291_v44 = vunpack.c.l.b16 %v277_v43 }
  0xd2   :  { %373 = vrot.lane.b32.xlu0 %v366_v45, %s1717_s29  ;;  %v1624_v45 = vld [vmem:[%s2323_s2 + $0x34] sm:$0xf0] }
  0xd3   :  { %v295_v49 = vpack.c.b16 %v291_v44, %v290_v42  ;;  %v1407_v42 = vld [vmem:[%s2323_s2 + $0x48] sm:$0xf0]  ;;  %v1397_v44 = vld [vmem:[%s2323_s2 + $0x30] sm:$0xf] }
  0xd4   :  { %v240_v52 = vpop.f32.mrf.mxu0  ;;  %v270_v53 = vpop.f32.mrf.mxu1  ;;  %v1410_v43 = vor.u32 %v1625_v39, %v1407_v42  ;;  %v1398_v47 = vor.u32 %v1624_v45, %v1397_v44 }
  0xd5   :  { %v269_v55 = vadd.f32 %v268_v36, %v240_v52  ;;  %v317_v56 = vshll.u32 %v295_v49, 16  ;;  %v314_v58 = vshrl.u32 %v295_v49, 16  ;;  %v367_v9 = vrot.slane %v295_v49, 7  ;;  %v1621_v52 = vld [vmem:[%s2323_s2 + $0x24] sm:$0xf] }
  0xd6   :  { %v1391_v53 = vld [vmem:[%s2323_s2 + $0x28] sm:$0xf0] }
  0xd7   :  { %v278_v59 = vpack.c.bf16 %v269_v55, %v269_v55  ;;  %v335_v60 = vrot.slane %v317_v56, 1  ;;  %v316_v61 = vrot.slane %v314_v58, 7  ;;  %v368_v15 = vsel %vm326_vm9, %v365_v40, %v367_v9 }
  0xd8   :  { %v1394_v55 = vor.u32 %v1621_v52, %v1391_v53 }
  0xd9   :  { %v292_v62 = vunpack.c.l.b16 %v278_v59  ;;  %v336_v63 = vsel %vm329_vm11, %v334_v57, %v335_v60  ;;  %v319_v0 = vor.u32 %v317_v56, %v316_v61  ;;  %v337_v8 = vor.u32 %v335_v60, %v314_v58  ;;  %v491_v56 = vld [vmem:[%s2323_s2 + $0x90] sm:$0x77] }
  0xda   :  { %418 = vrot.lane.b32.xlu2 %v336_v63, %s1718_s30  ;;  %v383_v1 = vrot.slane %v336_v63, 7  ;;  %v547_v57 = vunpack.c.l.b16 %v491_v56  ;;  %v548_v58 = vunpack.c.h.b16 %v491_v56 }
  0xdb   :  { %v1944_v2 = vpack.c.b16 %v292_v62, %v292_v62  ;;  %v1947_v3 = vsel %vm297_vm10, %v308_v28, %v319_v0  ;;  %v1413_v28 = vld [vmem:[%s2323_s2 + $0x50] sm:$0xf]  ;;  %v1620_v62 = vld [vmem:[%s2323_s2 + $0x14] sm:$0xf0] }
  0xdc   :  { %v384_v4 = vsel %vm326_vm9, %v382_v32, %v383_v1  ;;  %v242_v5 = vpop.f32.mrf.mxu0  ;;  %v348_v6 = vrot.slane %v1947_v3, 7  ;;  %v1627_v32 = vld [vmem:[%s2323_s2 + $0x54] sm:$0xf]  ;;  %v1414_v35 = vor.u32 %v1628_v29, %v1413_v28  ;;  %v567_v59 = vpack.c.b16 %v547_v57, %v547_v57 }
  0xdd   :  { %391 = vrot.lane.b32.xlu1 %v384_v4, %s1717_s29  ;;  %v322_v7 = vshll.u32 %v1944_v2, 16  ;;  %v340_v14 = vshrl.u32 %v1944_v2, 16  ;;  %v369_v21 = vrot.slane %v1944_v2, 7  ;;  %v1418_v36 = vor.u32 %v1627_v32, %v1415_v33  ;;  %v1619_v4 = vld [vmem:[%s2323_s2 + $0x14] sm:$0xf] }
  0xde   :  { %v1956_v10 = vsel %vm326_vm9, %v346_v38, %v348_v6  ;;  %611 = vmatpush.bf16.msra.mxu2 %v1414_v35  ;;  %v1626_v38 = vld [vmem:[%s2323_s2 + $0x44] sm:$0xf0]  ;;  %v568_v60 = vpack.c.b16 %v548_v58, %v548_v58  ;;  %v604_v63 = vsel %vm602_vm13, %v567_v59, 0  ;;  %v1383_v5 = vld [vmem:[%s2323_s2 + $0x18] sm:$0xf0] }
  0xdf   :  { %v338_v11 = vrot.slane %v322_v7, 1  ;;  %v1959_v12 = vsel %vm297_vm10, %v316_v61, %v322_v7  ;;  %v1969_v17 = vsel %vm1908_vm12, %v340_v14, 0  ;;  %v370_v22 = vsel %vm326_vm9, %v367_v9, %v369_v21  ;;  %697 = vmatpush.bf16.msrb.mxu1 %v1418_v36  ;;  %v1381_v61 = vld [vmem:[%s2323_s2 + $0x10] sm:$0xf]  ;;  %658 = vmatpush.bf16.msra.mxu3 %v604_v63  ;;  %v1634_v9 = vld [vmem:[%s2323_s2 + $0x84] sm:$0xf0] }
  0xe0   :  { %v387_v19 = vrot.slane %v1969_v17, 7  ;;  %v607_v0 = vsel %vm602_vm13, %v568_v60, 0  ;;  %v1386_v7 = vor.u32 %v1619_v4, %v1383_v5  ;;  %v1439_v14 = vld [vmem:[%s2323_s2 + $0x88] sm:$0xf0]  ;;  %v1617_v21 = vld [vmem:[%s2323_s2 + $0x4] sm:$0xf] }
  0xe1   :  { %v339_v13 = vsel %vm329_vm11, %v337_v8, %v338_v11  ;;  %744 = vmatpush.bf16.msrb.mxu0 %v607_v0  ;;  %v1437_v8 = vld [vmem:[%s2323_s2 + $0x80] sm:$0xf]  ;;  %v1633_v11 = vld [vmem:[%s2323_s2 + $0x84] sm:$0xf] }
  0xe2   :  { %405 = vrot.lane.b32.xlu2 %v295_v49, %s1716_s1  ;;  %420 = vrot.lane.b32.xlu0 %v339_v13, %s1718_s30  ;;  %v385_v16 = vrot.slane %v339_v13, 7  ;;  %v1389_v49 = vld [vmem:[%s2323_s2 + $0x20] sm:$0xf]  ;;  %v1438_v13 = vor.u32 %v1634_v9, %v1437_v8 }
  0xe3   :  { %698 = vmatpush.bf16.msrb.mxu1 %v1410_v43  ;;  %v1390_v54 = vor.u32 %v1622_v50, %v1389_v49 }
  0xe4   :  { %v386_v18 = vsel %vm326_vm9, %v383_v1, %v385_v16  ;;  %v1976_v20 = vsel %vm326_vm9, %v385_v16, %v387_v19  ;;  %v1382_v1 = vor.u32 %v1620_v62, %v1381_v61  ;;  %v1618_v16 = vld [vmem:[%s2323_s2 + $0x4] sm:$0xf0]  ;;  %659 = vmatpush.bf16.msra.mxu3 %v1438_v13 }
  0xe5   :  { %375 = vrot.lane.b32.xlu1 %v368_v15, %s1717_s29  ;;  %v1373_v15 = vld [vmem:[%s2323_s2] sm:$0xf] }
  0xe6   :  { %v1374_v19 = vor.u32 %v1618_v16, %v1373_v15 }
  0xe7   :  { %699 = vmatpush.bf16.msrb.mxu1 %v1402_v51 }
  0xea   :  { %352 = vrot.lane.b32.xlu0 %v345_v37, %s1717_s29  ;;  %393 = vrot.lane.b32.xlu2 %v386_v18, %s1717_s29  ;;  %v1405_v37 = vld [vmem:[%s2323_s2 + $0x40] sm:$0xf]  ;;  %v1442_v18 = vor.u32 %v1633_v11, %v1439_v14 }
  0xeb   :  { %v1406_v40 = vor.u32 %v1626_v38, %v1405_v37  ;;  %700 = vmatpush.bf16.msrb.mxu1 %v1394_v55 }
  0xec   :  { %745 = vmatpush.bf16.msrb.mxu0 %v1442_v18 }
  0xed   :  { %612 = vmatpush.bf16.msra.mxu2 %v1406_v40 }
  0xef   :  { %701 = vmatpush.bf16.msrb.mxu1 %v1386_v7 }
  0xf1   :  { %613 = vmatpush.bf16.msra.mxu2 %v1398_v47 }
  0xf2   :  { %377 = vrot.lane.b32.xlu0 %v370_v22, %s1717_s29  ;;  %v1375_v22 = vld [vmem:[%s2323_s2 + $0x8] sm:$0xf0] }
  0xf3   :  { %v1378_v23 = vor.u32 %v1617_v21, %v1375_v22 }
  0xf5   :  { %614 = vmatpush.bf16.msra.mxu2 %v1390_v54  ;;  %702 = vmatpush.bf16.msrb.mxu1 %v1378_v23 }
  0xf9   :  { %615 = vmatpush.bf16.msra.mxu2 %v1382_v1 }
  0xfd   :  { %616 = vmatpush.bf16.msra.mxu2 %v1374_v19 }
 0x11f   :  { %v404_v29 = vpop.permute.xlu2 %403 }
 0x127   :  { %v402_v26 = vpop.permute.xlu0 %401 }
 0x128   :  { %v433_v27 = vsel %vm430_vm15, %v1915_v30, %v402_v26  ;;  %v436_v30 = vsel %vm430_vm15, %v1919_v34, %v404_v29 }
 0x129   :  { %v372_v24 = vpop.permute.xlu1 %371 }
 0x12a   :  { %v380_v25 = vsel %vm326_vm9, %v1944_v2, %v372_v24 }
 0x12b   :  { %407 = vrot.lane.b32.xlu1 %v380_v25, %s1716_s1 }
 0x133   :  { %395 = vrot.lane.b32.xlu1 %v1976_v20, %s1717_s29 }
 0x134   :  { %v419_v33 = vpop.permute.xlu2 %418 }
 0x135   :  { %v456_v35 = vsel %vm451_vm0, %v436_v30, %v419_v33 }
 0x13c   :  { %v417_v28 = vpop.permute.xlu0 %416 }
 0x13d   :  { %1443 = vmatmul.msk.bf16.vlgmr.msra.gmra.mxu3 %vm587_vm14, %v417_v28  ;;  %1450 = vmatmul.msk.bf16.vlgmr.msrb.gmra.mxu0 %vm587_vm14, %v417_v28  ;;  %v453_v2 = vsel %vm451_vm0, %v433_v27, %v417_v28 }
 0x13e   :  { %617 = vmatmul.bf16.vlgmr.msra.gmra.mxu2 %v453_v2  ;;  %703 = vmatmul.bf16.vlgmr.msrb.gmra.mxu1 %v453_v2  ;;  %v390_v31 = vpop.permute.xlu1 %389 }
 0x13f   :  { %v399_v20 = vsel %vm326_vm9, %v1969_v17, %v390_v31  ;;  %v406_v17 = vpop.permute.xlu2 %405 }
 0x140   :  { %422 = vrot.lane.b32.xlu2 %v399_v20, %s1718_s30  ;;  %v439_v40 = vsel %vm430_vm15, %v1947_v3, %v406_v17 }
 0x144   :  { %v374_v32 = vpop.permute.xlu0 %373 }
 0x145   :  { %409 = vrot.lane.b32.xlu0 %v374_v32, %s1716_s1 }
 0x147   :  { %v394_v38 = vpop.permute.xlu2 %393 }
 0x148   :  { %354 = vrot.lane.b32.xlu2 %v1926_v41, %s1717_s29  ;;  %v350_v41 = vrot.slane %v1959_v12, 7 }
 0x14a   :  { %v351_v39 = vsel %vm326_vm9, %v348_v6, %v350_v41 }
 0x14d   :  { %1444 = vmatmul.msk.bf16.gmra.mxu3 %vm587_vm14, %v419_v33  ;;  %1451 = vmatmul.msk.bf16.gmra.mxu0 %vm587_vm14, %v419_v33 }
 0x14e   :  { %622 = vmatmul.bf16.gmra.mxu2 %v456_v35  ;;  %708 = vmatmul.bf16.gmra.mxu1 %v456_v35 }
 0x14f   :  { %v392_v36 = vpop.permute.xlu1 %391 }
 0x150   :  { %424 = vrot.lane.b32.xlu1 %v392_v36, %s1718_s30  ;;  %356 = vrot.lane.b32.xlu2 %v1956_v10, %s1717_s29 }
 0x154   :  { %v421_v37 = vpop.permute.xlu0 %420 }
 0x155   :  { %v459_v10 = vsel %vm451_vm0, %v439_v40, %v421_v37 }
 0x157   :  { %v376_v34 = vpop.permute.xlu1 %375 }
 0x158   :  { %411 = vrot.lane.b32.xlu0 %v376_v34, %s1716_s1  ;;  %426 = vrot.lane.b32.xlu1 %v394_v38, %s1718_s30 }
 0x159   :  { %358 = vrot.lane.b32.xlu2 %v351_v39, %s1717_s29 }
 0x15c   :  { %v353_v42 = vpop.permute.xlu0 %352 }
 0x15d   :  { %1445 = vmatmul.msk.bf16.gmra.mxu3 %vm587_vm14, %v421_v37  ;;  %1452 = vmatmul.msk.bf16.gmra.mxu0 %vm587_vm14, %v421_v37  ;;  %v363_v3 = vsel %vm326_vm9, %v1959_v12, %v353_v42 }
 0x15e   :  { %627 = vmatmul.bf16.gmra.mxu2 %v459_v10  ;;  %713 = vmatmul.bf16.gmra.mxu1 %v459_v10 }
 0x164   :  { %v378_v43 = vpop.permute.xlu0 %377 }
 0x165   :  { %413 = vrot.lane.b32.xlu0 %v378_v43, %s1716_s1 }
 0x19a   :  { %v423_v44 = vpop.permute.xlu2 %422 }
 0x19b   :  { %1446 = vmatmul.msk.bf16.gmra.mxu3 %vm587_vm14, %v423_v44  ;;  %1453 = vmatmul.msk.bf16.gmra.mxu0 %vm587_vm14, %v423_v44 }
 0x19d   :  { %v408_v6 = vpop.permute.xlu1 %407 }
 0x19e   :  { %v441_v45 = vsel %vm430_vm15, %v363_v3, %v408_v6 }
 0x19f   :  { %v462_v46 = vsel %vm451_vm0, %v441_v45, %v423_v44 }
 0x1a0   :  { %632 = vmatmul.bf16.gmra.mxu2 %v462_v46  ;;  %718 = vmatmul.bf16.gmra.mxu1 %v462_v46 }
 0x1a2   :  { %v355_v53 = vpop.permute.xlu2 %354 }
 0x1a5   :  { %v396_v47 = vpop.permute.xlu1 %395 }
 0x1a6   :  { %428 = vrot.lane.b32.xlu1 %v396_v47, %s1718_s30 }
 0x1aa   :  { %v357_v8 = vpop.permute.xlu2 %356 }
 0x1b3   :  { %v359_v37 = vpop.permute.xlu2 %358 }
 0x1b7   :  { %v410_v51 = vpop.permute.xlu0 %409 }
 0x1b8   :  { %v444_v55 = vsel %vm430_vm15, %v355_v53, %v410_v51 }
 0x1ba   :  { %v747_v48 = vpop.f32.mrf.mxu0 }
 0x1bb   :  { %v704_v49 = vpop.f32.mrf.mxu1 }
 0x1bc   :  { %v748_v50 = vadd.f32 %v747_v48, %v704_v49 }
 0x1c0   :  { %v661_v52 = vpop.f32.mrf.mxu3 }
 0x1c1   :  { %v618_v54 = vpop.f32.mrf.mxu2 }
 0x1c2   :  { %v662_v12 = vadd.f32 %v661_v52, %v618_v54  ;;  %v425_v56 = vpop.permute.xlu1 %424  ;;  %v749_v57 = vpop.f32.mrf.mxu0 }
 0x1c3   :  { %1447 = vmatmul.msk.bf16.gmra.mxu3 %vm587_vm14, %v425_v56  ;;  %v706_v58 = vpop.f32.mrf.mxu1  ;;  %1454 = vmatmul.msk.bf16.gmra.mxu0 %vm587_vm14, %v425_v56  ;;  %v465_v59 = vsel %vm451_vm0, %v444_v55, %v425_v56  ;;  %v1642_v55 = vld [vmem:[%s2325_s4 + $0x38] sm:$0xff]  ;;  %v1641_v56 = vld [vmem:[%s2325_s4 + $0x30] sm:$0xff] }
 0x1c4   :  { %v750_v60 = vadd.f32 %v749_v57, %v706_v58  ;;  %637 = vmatmul.bf16.gmra.mxu2 %v465_v59  ;;  %723 = vmatmul.bf16.gmra.mxu1 %v465_v59  ;;  %v1649_v57 = vld [vmem:[%s2325_s4 + $0x70] sm:$0xff]  ;;  %v1640_v58 = vld [vmem:[%s2325_s4 + $0x28] sm:$0xff] }
 0x1c5   :  { %983 = vmatpush.bf16.msrb.mxu3 %v1642_v55  ;;  %v1648_v59 = vld [vmem:[%s2325_s4 + $0x68] sm:$0xff] }
 0x1c8   :  { %v663_v61 = vpop.f32.mrf.mxu3 }
 0x1c9   :  { %v620_v62 = vpop.f32.mrf.mxu2  ;;  %984 = vmatpush.bf16.msrb.mxu3 %v1641_v56 }
 0x1ca   :  { %v664_v63 = vadd.f32 %v663_v61, %v620_v62  ;;  %v752_v0 = vpop.f32.mrf.mxu0  ;;  %v412_v5 = vpop.permute.xlu0 %411  ;;  %v1647_v61 = vld [vmem:[%s2325_s4 + $0x60] sm:$0xff]  ;;  %v1638_v62 = vld [vmem:[%s2325_s4 + $0x18] sm:$0xff] }
 0x1cb   :  { %v709_v1 = vpop.f32.mrf.mxu1  ;;  %v447_v9 = vsel %vm430_vm15, %v357_v8, %v412_v5  ;;  %v427_v11 = vpop.permute.xlu1 %426 }
 0x1cc   :  { %v753_v4 = vadd.f32 %v752_v0, %v709_v1  ;;  %v468_v19 = vsel %vm451_vm0, %v447_v9, %v427_v11  ;;  %v1637_v0 = vld [vmem:[%s2325_s4 + $0x10] sm:$0xff] }
 0x1cd   :  { %985 = vmatpush.bf16.msrb.mxu3 %v1640_v58  ;;  %v1645_v1 = vld [vmem:[%s2325_s4 + $0x50] sm:$0xff] }
 0x1ce   :  { %v795_v7 = vmax.f32 %v748_v50, %v753_v4 }
 0x1d0   :  { %v666_v13 = vpop.f32.mrf.mxu3 }
 0x1d1   :  { %v623_v14 = vpop.f32.mrf.mxu2 }
 0x1d2   :  { %v667_v15 = vadd.f32 %v666_v13, %v623_v14  ;;  %v754_v16 = vpop.f32.mrf.mxu0 }
 0x1d3   :  { %1448 = vmatmul.msk.bf16.gmra.mxu3 %vm587_vm14, %v427_v11  ;;  %v711_v18 = vpop.f32.mrf.mxu1  ;;  %1455 = vmatmul.msk.bf16.gmra.mxu0 %vm587_vm14, %v427_v11 }
 0x1d4   :  { %v781_v21 = vmax.f32 %v662_v12, %v667_v15  ;;  %v755_v22 = vadd.f32 %v754_v16, %v711_v18  ;;  %642 = vmatmul.bf16.gmra.mxu2 %v468_v19  ;;  %728 = vmatmul.bf16.gmra.mxu1 %v468_v19  ;;  %v1650_v12 = vld [vmem:[%s2325_s4 + $0x78] sm:$0xff] }
 0x1d5   :  { %996 = vmatpush.bf16.msrb.mxu2 %v1650_v12 }
 0x1d6   :  { %v796_v23 = vmax.f32 %v750_v60, %v755_v22  ;;  %v1639_v60 = vld [vmem:[%s2325_s4 + $0x20] sm:$0xff] }
 0x1d7   :  { %v414_v35 = vpop.permute.xlu0 %413  ;;  %986 = vmatpush.bf16.msrb.mxu3 %v1639_v60 }
 0x1d8   :  { %v668_v24 = vpop.f32.mrf.mxu3  ;;  %v450_v41 = vsel %vm430_vm15, %v359_v37, %v414_v35 }
 0x1d9   :  { %v625_v25 = vpop.f32.mrf.mxu2  ;;  %997 = vmatpush.bf16.msrb.mxu2 %v1649_v57 }
 0x1da   :  { %v669_v26 = vadd.f32 %v668_v24, %v625_v25  ;;  %v757_v28 = vpop.f32.mrf.mxu0  ;;  %v1644_v25 = vld [vmem:[%s2325_s4 + $0x48] sm:$0xff] }
 0x1db   :  { %v714_v27 = vpop.f32.mrf.mxu1  ;;  %987 = vmatpush.bf16.msrb.mxu3 %v1638_v62 }
 0x1dc   :  { %v782_v29 = vmax.f32 %v664_v63, %v669_v26  ;;  %v758_v2 = vadd.f32 %v757_v28, %v714_v27  ;;  %v1646_v63 = vld [vmem:[%s2325_s4 + $0x58] sm:$0xff]  ;;  %v1635_v27 = vld [vmem:[%s2325_s4] sm:$0xff] }
 0x1dd   :  { %998 = vmatpush.bf16.msrb.mxu2 %v1648_v59  ;;  %v1643_v28 = vld [vmem:[%s2325_s4 + $0x40] sm:$0xff] }
 0x1de   :  { %v797_v31 = vmax.f32 %v795_v7, %v758_v2 }
 0x1df   :  { %988 = vmatpush.bf16.msrb.mxu3 %v1637_v0 }
 0x1e0   :  { %v671_v20 = vpop.f32.mrf.mxu3 }
 0x1e1   :  { %v628_v32 = vpop.f32.mrf.mxu2  ;;  %999 = vmatpush.bf16.msrb.mxu2 %v1647_v61 }
 0x1e2   :  { %v672_v33 = vadd.f32 %v671_v20, %v628_v32  ;;  %v759_v36 = vpop.f32.mrf.mxu0 }
 0x1e3   :  { %v716_v17 = vpop.f32.mrf.mxu1 }
 0x1e4   :  { %v783_v30 = vmax.f32 %v781_v21, %v672_v33  ;;  %v760_v42 = vadd.f32 %v759_v36, %v716_v17 }
 0x1e5   :  { %1000 = vmatpush.bf16.msrb.mxu2 %v1646_v63 }
 0x1e6   :  { %v798_v6 = vmax.f32 %v796_v23, %v760_v42  ;;  %v1636_v23 = vld [vmem:[%s2325_s4 + $0x8] sm:$0xff] }
 0x1e7   :  { %989 = vmatpush.bf16.msrb.mxu3 %v1636_v23 }
 0x1e8   :  { %v673_v40 = vpop.f32.mrf.mxu3 }
 0x1e9   :  { %v630_v39 = vpop.f32.mrf.mxu2  ;;  %1001 = vmatpush.bf16.msrb.mxu2 %v1645_v1 }
 0x1ea   :  { %v674_v46 = vadd.f32 %v673_v40, %v630_v39 }
 0x1eb   :  { %990 = vmatpush.bf16.msrb.mxu3 %v1635_v27 }
 0x1ec   :  { %v784_v52 = vmax.f32 %v782_v29, %v674_v46 }
 0x1ed   :  { %1002 = vmatpush.bf16.msrb.mxu2 %v1644_v25 }
 0x1f1   :  { %1003 = vmatpush.bf16.msrb.mxu2 %v1643_v28 }
 0x218   :  { %v429_v38 = vpop.permute.xlu1 %428  ;;  %v762_v10 = vpop.f32.mrf.mxu0 }
 0x219   :  { %1449 = vmatmul.msk.bf16.gmra.mxu3 %vm587_vm14, %v429_v38  ;;  %1456 = vmatmul.msk.bf16.gmra.mxu0 %vm587_vm14, %v429_v38  ;;  %v471_v34 = vsel %vm451_vm0, %v450_v41, %v429_v38 }
 0x21a   :  { %647 = vmatmul.bf16.gmra.mxu2 %v471_v34  ;;  %733 = vmatmul.bf16.gmra.mxu1 %v471_v34 }
 0x21d   :  { %v719_v43 = vpop.f32.mrf.mxu1 }
 0x21e   :  { %v2136_v44 = vadd.f32 %v762_v10, %v719_v43  ;;  %v676_v48 = vpop.f32.mrf.mxu3 }
 0x220   :  { %v799_v3 = vsel %vm785_vm1, %v2136_v44, -inf  ;;  %v764_v4 = vpop.f32.mrf.mxu0  ;;  %v823_v17 = vsel %vm808_vm2, %v2136_v44, -inf }
 0x221   :  { %v800_v45 = vmax.f32 %v797_v31, %v799_v3 }
 0x223   :  { %v2139_v47 = vmax.f32 %v800_v45, %v798_v6  ;;  %v633_v49 = vpop.f32.mrf.mxu2 }
 0x224   :  { %v2141_v50 = vadd.f32 %v676_v48, %v633_v49 }
 0x225   :  { %v721_v5 = vpop.f32.mrf.mxu1  ;;  %v802_v20 = vrot.slane %v2139_v47, 4 }
 0x226   :  { %v786_v51 = vsel %vm785_vm1, %v2141_v50, -inf  ;;  %v678_v7 = vpop.f32.mrf.mxu3  ;;  %v765_v37 = vadd.f32 %v764_v4, %v721_v5 }
 0x227   :  { %v787_v53 = vmax.f32 %v783_v30, %v786_v51  ;;  %v803_v39 = vmax.f32 %v2139_v47, %v802_v20  ;;  %v809_v51 = vsel %vm808_vm2, %v2141_v50, -inf }
 0x229   :  { %v2144_v54 = vmax.f32 %v787_v53, %v784_v52  ;;  %v804_v44 = vrot.slane %v803_v39, 2 }
 0x22b   :  { %v635_v8 = vpop.f32.mrf.mxu2  ;;  %v789_v3 = vrot.slane %v2144_v54, 4  ;;  %v805_v1 = vmax.f32 %v803_v39, %v804_v44  ;;  %v1539_v39 = vld [vmem:[%s2329_s8 + $0x20] sm:$0xf] }
 0x22c   :  { %v679_v53 = vadd.f32 %v678_v7, %v635_v8 }
 0x22d   :  { %v790_v59 = vmax.f32 %v2144_v54, %v789_v3  ;;  %v839_v54 = vld [vmem:[%s2324_s3] sm:$0x3]  ;;  %v1654_v3 = vld [vmem:[%s2329_s8 + $0x14] sm:$0xf0] }
 0x22e   :  { %v841_v20 = vperm.slane %v839_v54, 0 }
 0x240   :  { %v767_v9 = vpop.f32.mrf.mxu0 }
 0x241   :  { %v724_v11 = vpop.f32.mrf.mxu1 }
 0x242   :  { %v768_v31 = vadd.f32 %v767_v9, %v724_v11  ;;  %v791_v9 = vrot.slane %v790_v59, 2 }
 0x244   :  { %v824_v41 = vmax.f32 %v823_v17, %v768_v31 }
 0x246   :  { %v681_v13 = vpop.f32.mrf.mxu3 }
 0x247   :  { %v638_v14 = vpop.f32.mrf.mxu2 }
 0x248   :  { %v769_v15 = vpop.f32.mrf.mxu0  ;;  %v682_v42 = vadd.f32 %v681_v13, %v638_v14  ;;  %v806_v13 = vrot.slane %v805_v1, 1 }
 0x249   :  { %v726_v16 = vpop.f32.mrf.mxu1 }
 0x24a   :  { %v770_v33 = vadd.f32 %v769_v15, %v726_v16  ;;  %v810_v55 = vmax.f32 %v809_v51, %v682_v42  ;;  %v1655_v51 = vld [vmem:[%s2329_s8 + $0x24] sm:$0xf] }
 0x24c   :  { %v825_v10 = vmax.f32 %v765_v37, %v770_v33 }
 0x24e   :  { %v683_v18 = vpop.f32.mrf.mxu3 }
 0x24f   :  { %v640_v19 = vpop.f32.mrf.mxu2 }
 0x250   :  { %v772_v21 = vpop.f32.mrf.mxu0  ;;  %v684_v45 = vadd.f32 %v683_v18, %v640_v19  ;;  %v792_v18 = vmax.f32 %v790_v59, %v791_v9 }
 0x251   :  { %v729_v22 = vpop.f32.mrf.mxu1 }
 0x252   :  { %v773_v30 = vadd.f32 %v772_v21, %v729_v22  ;;  %v811_v60 = vmax.f32 %v679_v53, %v684_v45  ;;  %v842_v22 = vperm.slane %v839_v54, 1  ;;  %v1523_v45 = vld [vmem:[%s2329_s8] sm:$0xf]  ;;  %v1660_v54 = vld [vmem:[%s2331_s10 + $0x18] sm:$0xff] }
 0x254   :  { %v826_v43 = vmax.f32 %v824_v41, %v773_v30  ;;  %v1026_v41 = vld [vmem:[%s2329_s8 + $0x30] sm:$0x11] }
 0x256   :  { %v686_v24 = vpop.f32.mrf.mxu3 }
 0x257   :  { %v643_v26 = vpop.f32.mrf.mxu2 }
 0x258   :  { %v774_v29 = vpop.f32.mrf.mxu0  ;;  %v687_v46 = vadd.f32 %v686_v24, %v643_v26  ;;  %v807_v24 = vmax.f32 %v805_v1, %v806_v13  ;;  %v793_v26 = vrot.slane %v792_v18, 1 }
 0x259   :  { %v731_v2 = vpop.f32.mrf.mxu1 }
 0x25a   :  { %v775_v38 = vadd.f32 %v774_v29, %v731_v2  ;;  %v812_v61 = vmax.f32 %v810_v55, %v687_v46  ;;  %v1652_v46 = vld [vmem:[%s2329_s8 + $0x4] sm:$0xf0] }
 0x25c   :  { %v827_v48 = vmax.f32 %v825_v10, %v775_v38  ;;  %v1052_v38 = vunpack.c.l.b16 %v1026_v41 }
 0x25e   :  { %v688_v32 = vpop.f32.mrf.mxu3 }
 0x25f   :  { %v645_v35 = vpop.f32.mrf.mxu2 }
 0x260   :  { %v689_v47 = vadd.f32 %v688_v32, %v645_v35  ;;  %v794_v32 = vmax.f32 %v792_v18, %v793_v26  ;;  %v1671_v18 = vld [vmem:[%s2331_s10 + $0x70] sm:$0xff] }
 0x261   :  { %v1667_v26 = vld [vmem:[%s2331_s10 + $0x50] sm:$0xff] }
 0x262   :  { %v813_v4 = vmax.f32 %v811_v60, %v689_v47  ;;  %v1653_v47 = vld [vmem:[%s2329_s8 + $0x14] sm:$0xf] }
 0x296   :  { %v777_v36 = vpop.f32.mrf.mxu0 }
 0x297   :  { %v734_v34 = vpop.f32.mrf.mxu1 }
 0x298   :  { %v778_v40 = vadd.f32 %v777_v36, %v734_v34  ;;  %v1060_v34 = vpack.c.b16 %v1052_v38, %v1052_v38 }
 0x29a   :  { %v828_v6 = vsel %vm212_vm6, %v778_v40, -inf  ;;  %v1656_v40 = vld [vmem:[%s2329_s8 + $0x24] sm:$0xf0]  ;;  %v1072_v42 = vsel %vm326_vm9, %v1060_v34, 0 }
 0x29b   :  { %v829_v49 = vmax.f32 %v826_v43, %v828_v6  ;;  %1081 = vmatpush.bf16.msra.mxu3 %v1072_v42  ;;  %v1540_v10 = vor.u32 %v1656_v40, %v1539_v39  ;;  %v1531_v43 = vld [vmem:[%s2329_s8 + $0x10] sm:$0xf]  ;;  %v1683_v40 = vld [vmem:[%s2332_s11] ss:$0 sm:$0xff] }
 0x29c   :  { %v691_v52 = vpop.f32.mrf.mxu3  ;;  %v1532_v6 = vor.u32 %v1654_v3, %v1531_v43 }
 0x29d   :  { %v830_v12 = vmax.f32 %v829_v49, %v827_v48  ;;  %v648_v56 = vpop.f32.mrf.mxu2  ;;  %v1524_v48 = vor.u32 %v1652_v46, %v1523_v45  ;;  %v1053_v49 = vunpack.c.h.b16 %v1026_v41 }
 0x29e   :  { %v692_v57 = vadd.f32 %v691_v52, %v648_v56  ;;  %v779_v58 = vpop.f32.mrf.mxu0  ;;  %v1541_v52 = vld [vmem:[%s2329_s8 + $0x28] sm:$0xf0] }
 0x29f   :  { %v831_v62 = vrot.slane %v830_v12, 4  ;;  %v736_v63 = vpop.f32.mrf.mxu1  ;;  %1082 = vmatpush.bf16.msra.mxu3 %v1540_v10  ;;  %v1061_v44 = vpack.c.b16 %v1053_v49, %v1053_v49  ;;  %v1544_v55 = vor.u32 %v1655_v51, %v1541_v52  ;;  %v1525_v58 = vld [vmem:[%s2329_s8 + $0x8] sm:$0xf0] }
 0x2a0   :  { %v814_v0 = vsel %vm212_vm6, %v692_v57, -inf  ;;  %v1651_v57 = vld [vmem:[%s2329_s8 + $0x4] sm:$0xf]  ;;  %v1663_v63 = vld [vmem:[%s2331_s10 + $0x30] sm:$0xff]  ;;  %vm1265_vm6 = vcmask 74752  }
 0x2a1   :  { %v832_v5 = vmax.f32 %v830_v12, %v831_v62  ;;  %v815_v50 = vmax.f32 %v812_v61, %v814_v0  ;;  %v1075_v53 = vsel %vm326_vm9, %v1061_v44, 0  ;;  %v1533_v12 = vld [vmem:[%s2329_s8 + $0x18] sm:$0xf0]  ;;  %v1528_v59 = vor.u32 %v1651_v57, %v1525_v58  ;;  %v1680_v62 = vld [vmem:[%s2326_s5] ss:$0 sm:$0xff] }
 0x2a2   :  { %v1536_v56 = vor.u32 %v1653_v47, %v1533_v12  ;;  %v1664_v61 = vld [vmem:[%s2331_s10 + $0x38] sm:$0xff] }
 0x2a3   :  { %v833_v7 = vrot.slane %v832_v5, 2  ;;  %v816_v8 = vmax.f32 %v815_v50, %v813_v4  ;;  %1083 = vmatpush.bf16.msra.mxu3 %v1532_v6  ;;  %1239 = vmatpush.bf16.msra.mxu2 %v1664_v61  ;;  %v1681_v4 = vld [vmem:[%s2327_s6] ss:$0 sm:$0xff] }
 0x2a4   :  { %v693_v11 = vpop.f32.mrf.mxu3 }
 0x2a5   :  { %v834_v14 = vmax.f32 %v832_v5, %v833_v7  ;;  %v817_v15 = vrot.slane %v816_v8, 4  ;;  %v650_v16 = vpop.f32.mrf.mxu2  ;;  %v1662_v5 = vld [vmem:[%s2331_s10 + $0x28] sm:$0xff]  ;;  %v1682_v7 = vld [vmem:[%s2328_s7] ss:$0 sm:$0xff] }
 0x2a6   :  { %v1661_v11 = vld [vmem:[%s2331_s10 + $0x20] sm:$0xff] }
 0x2a7   :  { %v835_v19 = vrot.slane %v834_v14, 1  ;;  %v818_v21 = vmax.f32 %v816_v8, %v817_v15  ;;  %1084 = vmatpush.bf16.msra.mxu3 %v1524_v48  ;;  %1240 = vmatpush.bf16.msra.mxu2 %v1663_v63  ;;  %v1672_v15 = vld [vmem:[%s2331_s10 + $0x78] sm:$0xff] }
 0x2a9   :  { %v819_v23 = vrot.slane %v818_v21, 2  ;;  %v836_v25 = vmax.f32 %v834_v14, %v835_v19  ;;  %v1659_v19 = vld [vmem:[%s2331_s10 + $0x10] sm:$0xff] }
 0x2ab   :  { %v820_v27 = vmax.f32 %v818_v21, %v819_v23  ;;  %v838_v28 = vsel %vm326_vm9, %v807_v24, %v836_v25  ;;  %1241 = vmatpush.bf16.msra.mxu2 %v1662_v5  ;;  %v1658_v21 = vld [vmem:[%s2331_s10 + $0x8] sm:$0xff]  ;;  %v1657_v23 = vld [vmem:[%s2331_s10] sm:$0xff]  ;;  %v1668_v25 = vld [vmem:[%s2331_s10 + $0x58] sm:$0xff] }
 0x2ac   :  { %v846_v29 = vadd.f32 %v842_v22, %v838_v28  ;;  %v1670_v22 = vld [vmem:[%s2331_s10 + $0x68] sm:$0xff]  ;;  %v1669_v24 = vld [vmem:[%s2331_s10 + $0x60] sm:$0xff] }
 0x2ad   :  { %v821_v2 = vrot.slane %v820_v27, 1  ;;  %v1665_v28 = vld [vmem:[%s2331_s10 + $0x40] sm:$0xff] }
 0x2ae   :  { %v848_v31 = vmax.f32 %v846_v29, 0.0  ;;  %v1027_v29 = vld [vmem:[%s2330_s9] sm:$0x3]  ;;  %s1719_s9 = smov [#allocation2]  }
 0x2af   :  { %v822_v33 = vmax.f32 %v820_v27, %v821_v2  ;;  %1242 = vmatpush.bf16.msra.mxu2 %v1661_v11  ;;  %v1666_v27 = vld [vmem:[%s2331_s10 + $0x48] sm:$0xff]  ;;  %v1029_v2 = vperm.slane %v1027_v29, 0  ;;  %s1283_s11 = sshll.u32 %s1719_s9, 4  ;;  %s1284_s11 = int_to_ptr.vmem [resolvable:$true] %s1283_s11 }
 0x2b0   :  { %v850_v30 = vpack.c.bf16 %v848_v31, %v848_v31 }
 0x2b1   :  { %v837_v35 = vsel %vm326_vm9, %v794_v32, %v822_v33 }
 0x2b2   :  { %1004 = vmatmul.bf16.vlgmr.msrb.gmra.mxu2 %v850_v30  ;;  %v845_v17 = vadd.f32 %v841_v20, %v837_v35  ;;  %v1030_v35 = vperm.slane %v1027_v29, 1 }
 0x2b3   :  { %1243 = vmatpush.bf16.msra.mxu2 %v1660_v54 }
 0x2b4   :  { %v847_v36 = vmax.f32 %v845_v17, 0.0 }
 0x2b6   :  { %v849_v37 = vpack.c.bf16 %v847_v36, %v847_v36 }
 0x2b7   :  { %1244 = vmatpush.bf16.msra.mxu2 %v1659_v19 }
 0x2b8   :  { %991 = vmatmul.bf16.vlgmr.msrb.gmra.mxu3 %v849_v37 }
 0x2b9   :  { %1094 = vmatpush.bf16.msrb.mxu3 %v1075_v53 }
 0x2bb   :  { %1245 = vmatpush.bf16.msra.mxu2 %v1658_v21 }
 0x2bd   :  { %1095 = vmatpush.bf16.msrb.mxu3 %v1544_v55 }
 0x2bf   :  { %1246 = vmatpush.bf16.msra.mxu2 %v1657_v23 }
 0x2c1   :  { %1096 = vmatpush.bf16.msrb.mxu3 %v1536_v56 }
 0x2c5   :  { %1097 = vmatpush.bf16.msrb.mxu3 %v1528_v59 }
 0x335   :  { %v1005_v60 = vpop.f32.mrf.mxu2 }
 0x33b   :  { %v992_v0 = vpop.f32.mrf.mxu3 }
 0x33c   :  { %v993_v1 = vadd.f32 %v1680_v62, %v992_v0 }
 0x33d   :  { %v1007_v50 = vpop.f32.mrf.mxu2 }
 0x33e   :  { %v1006_v9 = vadd.f32 %v1005_v60, %v993_v1 }
 0x340   :  { %v1013_v8 = vmul.f32 %v1681_v4, %v1006_v9 }
 0x342   :  { %v1018_v13 = vadd.f32 %v1682_v7, %v1013_v8 }
 0x343   :  { %v994_v14 = vpop.f32.mrf.mxu3 }
 0x344   :  { %v1019_v16 = vpack.c.bf16 %v1018_v13, %v1018_v13 }
 0x346   :  { %1545 = vmatmul.msk.bf16.vlgmr.msra.gmra.mxu3 %vm430_vm15, %v1019_v16 }
 0x347   :  { %1252 = vmatpush.bf16.msra.mxu3 %v1672_v15 }
 0x34b   :  { %1253 = vmatpush.bf16.msra.mxu3 %v1671_v18 }
 0x34f   :  { %1254 = vmatpush.bf16.msra.mxu3 %v1670_v22 }
 0x353   :  { %1255 = vmatpush.bf16.msra.mxu3 %v1669_v24 }
 0x356   :  { %1546 = vmatmul.msk.bf16.vlgmr.msrb.gmra.mxu3 %vm430_vm15, %v1019_v16 }
 0x357   :  { %1256 = vmatpush.bf16.msra.mxu3 %v1668_v25 }
 0x35b   :  { %1257 = vmatpush.bf16.msra.mxu3 %v1667_v26 }
 0x35f   :  { %1258 = vmatpush.bf16.msra.mxu3 %v1666_v27 }
 0x363   :  { %1259 = vmatpush.bf16.msra.mxu3 %v1665_v28 }
 0x3c9   :  { %v1086_v31 = vpop.f32.mrf.mxu3 }
 0x3ca   :  { %v1087_v20 = vadd.f32 %v1086_v31, %v1029_v2 }
 0x3cc   :  { %v1103_v32 = vmax.f32 %v1087_v20, 0.0 }
 0x3ce   :  { %v1105_v33 = vpack.c.bf16 %v1103_v32, %v1103_v32 }
 0x3d0   :  { %1247 = vmatmul.bf16.vlgmr.msra.gmra.mxu2 %v1105_v33 }
 0x3d1   :  { %v1088_v30 = vpop.f32.mrf.mxu3 }
 0x3d9   :  { %v1099_v17 = vpop.f32.mrf.mxu3 }
 0x3da   :  { %v1100_v36 = vadd.f32 %v1099_v17, %v1030_v35 }
 0x3dc   :  { %v1104_v37 = vmax.f32 %v1100_v36, 0.0 }
 0x3de   :  { %v1106_v41 = vpack.c.bf16 %v1104_v37, %v1104_v37 }
 0x3e0   :  { %1260 = vmatmul.bf16.vlgmr.msra.gmra.mxu3 %v1106_v41 }
 0x3e1   :  { %v1101_v38 = vpop.f32.mrf.mxu3 }
 0x453   :  { %v1248_v34 = vpop.f32.mrf.mxu2 }
 0x454   :  { %v1249_v42 = vadd.f32 %v1683_v40, %v1248_v34 }
 0x45b   :  { %v1250_v39 = vpop.f32.mrf.mxu2 }
 0x463   :  { %v1261_v10 = vpop.f32.mrf.mxu3 }
 0x464   :  { %v1262_v43 = vadd.f32 %v1261_v10, %v1249_v42 }
 0x466   :  { %v1266_v3 = vsel %vm1265_vm6, %v1262_v43, -inf }
 0x467   :  { %1267 = vmax.xlane.f32.xlu2 %v1266_v3 }
 0x46b   :  { %v1263_v6 = vpop.f32.mrf.mxu3 }
 0x4da   :  { %v1268_v45 = vpop.xlane.xlu2 %1267 }
 0x4db   :  { %v1269_v46 = vsub.f32 %v1262_v43, %v1268_v45 }
 0x4dd   :  { %v1270_v48 = vmul.f32 1.442695, %v1269_v46 }
 0x4df   :  { %1684 = vpow2.f32 %v1270_v48 }
 0x4e5   :  { %v1685_v49 = vpop.eup %1684 }
 0x4e6   :  { %v1272_v44 = vsel %vm1265_vm6, %v1685_v49, 0.0 }
 0x4e7   :  { %1273 = vadd.xlane.f32.xlu0 %v1272_v44 }
 0x55a   :  { %v1274_v51 = vpop.xlane.xlu0 %1273 }
 0x55b   :  { %1686 = vrcp.f32 %v1274_v51 }
 0x561   :  { %v1687_v52 = vpop.eup %1686 }
 0x562   :  { %v1276_v53 = vmul.f32 %v1687_v52, %v1685_v49 }
 0x564   :  { %1277 = vst.msk [vmem:[#allocation2] sm:$0x3] %vm1265_vm6, %v1276_v53 }
 0x565   :  { %1288 = dma.vmem_to_hbm [thread:$0]  %s1284_s11, 32, %s1286_s21, [#allocation3]  }
 0x566   :  { %1712 = dma.done.wait [#allocation3], 32  }
 0x567   :  { %1713 = vsyncadd [#allocation3], 4294967264 }
 0x568   :  { %1293 = vsyncpa [#allocation3], 1 }

</bundles_post_ra>
